<compile_context>
chip_gen: v6e
topology: v6e:2x2x1
jax: 0.10.0
libtpu: 0.0.40
codegen_flags: <defaults>
</compile_context>

<pallas_src>
import jax
import jax.numpy as jnp
from jax import lax
from jax.experimental import pallas as pl
from jax.experimental.pallas import tpu as pltpu

# ---- static config (mirrors the PyTorch `args`) ----------------------------
N     = 2            # batch
CIN   = 2            # args.EMBEDDING.in_channels
E     = 4            # args.num_channels
SFREQ = 32           # args.sfreq
T     = 192          # time samples (divisible by 8*12)
KT1   = SFREQ // 4   # 8   temporal kernel of conv-1
KT2   = SFREQ // 8   # 4   temporal kernel of depthwise conv
LP1, RP1 = (KT1 - 1) // 2, (KT1 - 1) - (KT1 - 1) // 2   # PyTorch 'same' padding
LP2, RP2 = (KT2 - 1) // 2, (KT2 - 1) - (KT2 - 1) // 2
T1    = T // 8       # after AvgPool [1,8]   -> 24
T2    = T1 // 12     # after AvgPool [1,12]  -> 2
TP1   = T + KT1 - 1  # pre-padded time length fed to the kernel
EPS   = 1e-5


# ---------------------------------------------------------------------------
# Pallas kernel: whole EmbeddingBlock forward for ONE batch element.
# ---------------------------------------------------------------------------
def _embedding_kernel(x_ref, weff_ref, beff_ref, p1_ref,
                      wcomb_ref, shift3_ref, p2_ref, o_ref):

    def elu(v):  # ELU(alpha=1)
        return jnp.where(v > 0, v, jnp.exp(jnp.minimum(v, 0.0)) - 1.0)

    xv = x_ref[0]                                     # (CIN*E, TP1), time pre-padded

    # ---- block_1 fused: conv1+BN1+conv2+BN2 as a single MXU matmul ---------
    # im2col row index = j*(CIN*E) + c*E + e  (matches Weff column layout)
    im1 = jnp.concatenate([xv[:, j:j + T] for j in range(KT1)], axis=0)   # (KT1*CIN*E, T)
    z = jnp.dot(weff_ref[...], im1, preferred_element_type=jnp.float32) + beff_ref[...]
    z = elu(z)                                                            # (24, T)
    h = jnp.dot(z, p1_ref[...], preferred_element_type=jnp.float32)      # AvgPool[1,8] -> (24, T1)

    # ---- block_2 fused: depthwise('same') + pointwise 1x1 + BN3 ------------
    h_pad = jnp.concatenate([jnp.zeros((24, LP2), jnp.float32),
                             h,
                             jnp.zeros((24, RP2), jnp.float32)], axis=1)  # (24, T1+KT2-1)
    # im2col row index = j*24 + i  (matches Wcomb column layout)
    im2 = jnp.concatenate([h_pad[:, j:j + T1] for j in range(KT2)], axis=0)  # (KT2*24, T1)
    pw = jnp.dot(wcomb_ref[...], im2, preferred_element_type=jnp.float32) + shift3_ref[...]
    pw = elu(pw)                                                          # (24, T1)
    o_ref[0] = jnp.dot(pw, p2_ref[...], preferred_element_type=jnp.float32)  # AvgPool[1,12] -> (24, T2)


# ---------------------------------------------------------------------------
# Parameters (deterministic synthetic init, PyTorch shapes)
# ---------------------------------------------------------------------------
def init_params(key):
    ks = jax.random.split(key, 10)
    p = {}
    p['W1']  = 0.2 * jax.random.normal(ks[0], (6, CIN, 1, KT1), jnp.float32)
    p['b1']  = 0.1 * jax.random.normal(ks[1], (6,), jnp.float32)
    p['W2']  = 0.2 * jax.random.normal(ks[2], (24, 6, E, 1), jnp.float32)
    p['b2']  = 0.1 * jax.random.normal(ks[3], (24,), jnp.float32)
    p['Wdw'] = 0.2 * jax.random.normal(ks[4], (24, 1, 1, KT2), jnp.float32)
    p['bdw'] = 0.1 * jax.random.normal(ks[5], (24,), jnp.float32)
    p['Wpw'] = 0.2 * jax.random.normal(ks[6], (24, 24, 1, 1), jnp.float32)

    def bn(k, c):
        k1, k2, k3, k4 = jax.random.split(k, 4)
        gamma = 1.0 + 0.1 * jax.random.normal(k1, (c,), jnp.float32)
        beta  = 0.1 * jax.random.normal(k2, (c,), jnp.float32)
        mean  = 0.1 * jax.random.normal(k3, (c,), jnp.float32)
        var   = 0.5 + jax.random.uniform(k4, (c,), jnp.float32)
        return gamma, beta, mean, var

    p['bn1'] = bn(ks[7], 6)
    p['bn2'] = bn(ks[8], 24)
    p['bn3'] = bn(ks[9], 24)
    return p


def bn_scale_shift(bn):
    gamma, beta, mean, var = bn
    s = gamma / jnp.sqrt(var + EPS)
    return s, beta - mean * s


# ---------------------------------------------------------------------------
# Wrapper: host-side weight folding (glue) + pallas_call
# ---------------------------------------------------------------------------
def embedding_block_pallas(x, p):
    n = x.shape[0]
    # 'same' time padding for conv-1 done here; flatten (CIN, E) -> sublane axis.
    x_pad = jnp.pad(x, ((0, 0), (0, 0), (0, 0), (LP1, RP1))).reshape(n, CIN * E, TP1)

    s1, t1b = bn_scale_shift(p['bn1'])
    s2, t2b = bn_scale_shift(p['bn2'])
    s3, t3b = bn_scale_shift(p['bn3'])

    # --- fold conv1 + BN1 + conv2 + BN2 into Weff/beff ---
    W1f = p['W1'][:, :, 0, :]                    # (6, CIN, KT1)   [m, c, j]
    W2f = p['W2'][:, :, :, 0]                    # (24, 6, E)      [o, m, e]
    # Weff[o, j, c, e] = s2[o] * sum_m W2f[o,m,e] * s1[m] * W1f[m,c,j]
    Weff = jnp.einsum('ome,m,mcj->ojce', W2f, s1, W1f) * s2[:, None, None, None]
    Weff = Weff.reshape(24, KT1 * CIN * E)       # column index = j*CIN*E + c*E + e
    inner = s1 * p['b1'] + t1b                   # (6,)
    beff = s2 * (jnp.einsum('ome,m->o', W2f, inner) + p['b2']) + t2b   # (24,)

    # --- fold depthwise conv + pointwise conv + BN3 into Wcomb/shift3 ---
    Wdwf = p['Wdw'][:, 0, 0, :]                  # (24, KT2)  [i, j]
    Wpwf = p['Wpw'][:, :, 0, 0]                  # (24, 24)   [o, i]
    Wpw_eff = Wpwf * s3[:, None]
    Wcomb = jnp.einsum('oi,ij->oji', Wpw_eff, Wdwf).reshape(24, KT2 * 24)  # col = j*24 + i
    shift3 = Wpw_eff @ p['bdw'] + t3b            # (24,)

    # AvgPool as matmuls (MXU is idle; pooling there is free)
    P1 = jnp.repeat(jnp.eye(T1, dtype=jnp.float32), 8, axis=0) / 8.0        # (T,  T1)
    P2 = jnp.repeat(jnp.eye(T2, dtype=jnp.float32), 12, axis=0) / 12.0      # (T1, T2)

    col = lambda v: v.astype(jnp.float32)[:, None]
    args = (x_pad, Weff, col(beff), P1, Wcomb, col(shift3), P2)

    def cspec(a):
        zeros = (0,) * a.ndim
        return pl.BlockSpec(a.shape, lambda b, zeros=zeros: zeros)

    in_specs = ([pl.BlockSpec((1, CIN * E, TP1), lambda b: (b, 0, 0))]
                + [cspec(a) for a in args[1:]])

    out = pl.pallas_call(
        _embedding_kernel,
        out_shape=jax.ShapeDtypeStruct((n, 24, T2), jnp.float32),
        grid_spec=pltpu.PrefetchScalarGridSpec(
            num_scalar_prefetch=0,
            grid=(n,),
            in_specs=in_specs,
            out_specs=pl.BlockSpec((1, 24, T2), lambda b: (b, 0, 0)),
        ),
        compiler_params=pltpu.CompilerParams(dimension_semantics=("parallel",)),
    )(*args)

    return out[:, :, None, :]          # (N, 24, 1, T2) -- same NCHW shape as PyTorch


# ---------------------------------------------------------------------------
# Pure-JAX reference (same eval-mode semantics) for a correctness check
# ---------------------------------------------------------------------------
def embedding_block_reference(x, p):
    dn = ('NCHW', 'OIHW', 'NCHW')
    prec = lax.Precision.HIGHEST
    h = jnp.pad(x, ((0, 0), (0, 0), (0, 0), (LP1, RP1)))
    h = lax.conv_general_dilated(h, p['W1'], (1, 1), 'VALID',
                                 dimension_numbers=dn, precision=prec)
    h = h + p['b1'][None, :, None, None]
    s1, t1b = bn_scale_shift(p['bn1'])
    h = h * s1[None, :, None, None] + t1b[None, :, None, None]
    h = lax.conv_general_dilated(h, p['W2'], (1, 1), 'VALID',
                                 dimension_numbers=dn, precision=prec)
    h = h + p['b2'][None, :, None, None]
    s2, t2b = bn_scale_shift(p['bn2'])
    h = h * s2[None, :, None, None] + t2b[None, :, None, None]
    h = jax.nn.elu(h)
    h = h.reshape(h.shape[0], h.shape[1], h.shape[2], h.shape[3] // 8, 8).mean(-1)

    h = jnp.pad(h, ((0, 0), (0, 0), (0, 0), (LP2, RP2)))
    h = lax.conv_general_dilated(h, p['Wdw'], (1, 1), 'VALID', dimension_numbers=dn,
                                 feature_group_count=24, precision=prec)
    h = h + p['bdw'][None, :, None, None]
    h = lax.conv_general_dilated(h, p['Wpw'], (1, 1), 'VALID',
                                 dimension_numbers=dn, precision=prec)
    s3, t3b = bn_scale_shift(p['bn3'])
    h = h * s3[None, :, None, None] + t3b[None, :, None, None]
    h = jax.nn.elu(h)
    h = h.reshape(h.shape[0], h.shape[1], h.shape[2], h.shape[3] // 12, 12).mean(-1)
    return h


if __name__ == "__main__":
    key = jax.random.PRNGKey(0)
    kx, kp = jax.random.split(key)
    x = jax.random.normal(kx, (N, CIN, E, T), jnp.float32)   # (batch, in_ch, electrodes, time)
    params = init_params(kp)

    y = embedding_block_pallas(x, params)
    y = jax.block_until_ready(y)

    y_ref = embedding_block_reference(x, params)
    assert y.shape == (N, 24, 1, T2), y.shape
    assert jnp.allclose(y, y_ref, rtol=1e-3, atol=1e-3), float(jnp.max(jnp.abs(y - y_ref)))
    print("KERNEL_OK")
</pallas_src>

<mosaic_0001>
module attributes {stable_mosaic.version = 11 : i64} {
  func.func @_embedding_kernel(%arg0: i32, %arg1: memref<1x8x199xf32, #tpu.memory_space<vmem>>, %arg2: memref<24x64xf32, #tpu.memory_space<vmem>>, %arg3: memref<24x1xf32, #tpu.memory_space<vmem>>, %arg4: memref<192x24xf32, #tpu.memory_space<vmem>>, %arg5: memref<24x96xf32, #tpu.memory_space<vmem>>, %arg6: memref<24x1xf32, #tpu.memory_space<vmem>>, %arg7: memref<24x2xf32, #tpu.memory_space<vmem>>, %arg8: memref<1x24x2xf32, #tpu.memory_space<vmem>>) attributes {dimension_semantics = [#tpu.dimension_semantics<parallel>], iteration_bounds = array<i64: 2>, scalar_prefetch = 0 : i64, scratch_operands = 0 : i64, tpu.core_type = #tpu.core_type<tc>, window_params = [{transform_indices = @transform_0, window_bounds = array<i64: 1, 8, 199>}, {pipeline_mode = #tpu.pipeline_mode<synchronous>, transform_indices = @transform_1, window_bounds = array<i64: 24, 64>}, {pipeline_mode = #tpu.pipeline_mode<synchronous>, transform_indices = @transform_2, window_bounds = array<i64: 24, 1>}, {pipeline_mode = #tpu.pipeline_mode<synchronous>, transform_indices = @transform_3, window_bounds = array<i64: 192, 24>}, {pipeline_mode = #tpu.pipeline_mode<synchronous>, transform_indices = @transform_4, window_bounds = array<i64: 24, 96>}, {pipeline_mode = #tpu.pipeline_mode<synchronous>, transform_indices = @transform_5, window_bounds = array<i64: 24, 1>}, {pipeline_mode = #tpu.pipeline_mode<synchronous>, transform_indices = @transform_6, window_bounds = array<i64: 24, 2>}, {transform_indices = @transform_7, window_bounds = array<i64: 1, 24, 2>}]} {
    %c0 = arith.constant 0 : index
    %c0_0 = arith.constant 0 : index
    %c0_1 = arith.constant 0 : index
    %0 = vector.load %arg1[%c0, %c0_0, %c0_1] : memref<1x8x199xf32, #tpu.memory_space<vmem>>, vector<1x8x199xf32>
    %1 = vector.shape_cast %0 : vector<1x8x199xf32> to vector<8x199xf32>
    %2 = vector.extract_strided_slice %1 {offsets = [0, 0], sizes = [8, 192], strides = [1, 1]} : vector<8x199xf32> to vector<8x192xf32>
    %3 = vector.extract_strided_slice %1 {offsets = [0, 1], sizes = [8, 192], strides = [1, 1]} : vector<8x199xf32> to vector<8x192xf32>
    %4 = vector.extract_strided_slice %1 {offsets = [0, 2], sizes = [8, 192], strides = [1, 1]} : vector<8x199xf32> to vector<8x192xf32>
    %5 = vector.extract_strided_slice %1 {offsets = [0, 3], sizes = [8, 192], strides = [1, 1]} : vector<8x199xf32> to vector<8x192xf32>
    %6 = vector.extract_strided_slice %1 {offsets = [0, 4], sizes = [8, 192], strides = [1, 1]} : vector<8x199xf32> to vector<8x192xf32>
    %7 = vector.extract_strided_slice %1 {offsets = [0, 5], sizes = [8, 192], strides = [1, 1]} : vector<8x199xf32> to vector<8x192xf32>
    %8 = vector.extract_strided_slice %1 {offsets = [0, 6], sizes = [8, 192], strides = [1, 1]} : vector<8x199xf32> to vector<8x192xf32>
    %9 = vector.extract_strided_slice %1 {offsets = [0, 7], sizes = [8, 192], strides = [1, 1]} : vector<8x199xf32> to vector<8x192xf32>
    %10 = tpu.concatenate %2, %3, %4, %5, %6, %7, %8, %9 in 0 : vector<8x192xf32>, vector<8x192xf32>, vector<8x192xf32>, vector<8x192xf32>, vector<8x192xf32>, vector<8x192xf32>, vector<8x192xf32>, vector<8x192xf32> -> vector<64x192xf32>
    %c0_2 = arith.constant 0 : index
    %c0_3 = arith.constant 0 : index
    %11 = vector.load %arg2[%c0_2, %c0_3] : memref<24x64xf32, #tpu.memory_space<vmem>>, vector<24x64xf32>
    %cst = arith.constant dense<0.000000e+00> : vector<24x192xf32>
    %12 = tpu.matmul %11, %10, %cst {dimension_numbers = #tpu.dot_dimension_numbers<[1], [0], [0], [1], [0, 0, 1, 1], [], []>} : vector<24x64xf32>, vector<64x192xf32>, vector<24x192xf32> -> vector<24x192xf32>
    %c0_4 = arith.constant 0 : index
    %c0_5 = arith.constant 0 : index
    %13 = vector.load %arg3[%c0_4, %c0_5] : memref<24x1xf32, #tpu.memory_space<vmem>>, vector<24x1xf32>
    %14 = vector.broadcast %13 : vector<24x1xf32> to vector<24x192xf32>
    %15 = arith.addf %12, %14 : vector<24x192xf32>
    %cst_6 = arith.constant 0.000000e+00 : f32
    %16 = vector.broadcast %cst_6 : f32 to vector<24x192xf32>
    %17 = arith.cmpf ogt, %15, %16 : vector<24x192xf32>
    %cst_7 = arith.constant 0.000000e+00 : f32
    %18 = vector.broadcast %cst_7 : f32 to vector<24x192xf32>
    %19 = arith.minimumf %15, %18 : vector<24x192xf32>
    %20 = math.exp %19 : vector<24x192xf32>
    %cst_8 = arith.constant 1.000000e+00 : f32
    %21 = vector.broadcast %cst_8 : f32 to vector<24x192xf32>
    %22 = arith.subf %20, %21 : vector<24x192xf32>
    %23 = arith.select %17, %15, %22 : vector<24x192xi1>, vector<24x192xf32>
    %c0_9 = arith.constant 0 : index
    %c0_10 = arith.constant 0 : index
    %24 = vector.load %arg4[%c0_9, %c0_10] : memref<192x24xf32, #tpu.memory_space<vmem>>, vector<192x24xf32>
    %cst_11 = arith.constant dense<0.000000e+00> : vector<24x24xf32>
    %25 = tpu.matmul %23, %24, %cst_11 {dimension_numbers = #tpu.dot_dimension_numbers<[1], [0], [0], [1], [0, 0, 1, 1], [], []>} : vector<24x192xf32>, vector<192x24xf32>, vector<24x24xf32> -> vector<24x24xf32>
    %cst_12 = arith.constant 0.000000e+00 : f32
    %26 = vector.broadcast %cst_12 : f32 to vector<24x1xf32>
    %cst_13 = arith.constant 0.000000e+00 : f32
    %27 = vector.broadcast %cst_13 : f32 to vector<24x2xf32>
    %28 = tpu.concatenate %26, %25, %27 in 1 : vector<24x1xf32>, vector<24x24xf32>, vector<24x2xf32> -> vector<24x27xf32>
    %29 = vector.extract_strided_slice %28 {offsets = [0, 0], sizes = [24, 24], strides = [1, 1]} : vector<24x27xf32> to vector<24x24xf32>
    %30 = vector.extract_strided_slice %28 {offsets = [0, 1], sizes = [24, 24], strides = [1, 1]} : vector<24x27xf32> to vector<24x24xf32>
    %31 = vector.extract_strided_slice %28 {offsets = [0, 2], sizes = [24, 24], strides = [1, 1]} : vector<24x27xf32> to vector<24x24xf32>
    %32 = vector.extract_strided_slice %28 {offsets = [0, 3], sizes = [24, 24], strides = [1, 1]} : vector<24x27xf32> to vector<24x24xf32>
    %33 = tpu.concatenate %29, %30, %31, %32 in 0 : vector<24x24xf32>, vector<24x24xf32>, vector<24x24xf32>, vector<24x24xf32> -> vector<96x24xf32>
    %c0_14 = arith.constant 0 : index
    %c0_15 = arith.constant 0 : index
    %34 = vector.load %arg5[%c0_14, %c0_15] : memref<24x96xf32, #tpu.memory_space<vmem>>, vector<24x96xf32>
    %cst_16 = arith.constant dense<0.000000e+00> : vector<24x24xf32>
    %35 = tpu.matmul %34, %33, %cst_16 {dimension_numbers = #tpu.dot_dimension_numbers<[1], [0], [0], [1], [0, 0, 1, 1], [], []>} : vector<24x96xf32>, vector<96x24xf32>, vector<24x24xf32> -> vector<24x24xf32>
    %c0_17 = arith.constant 0 : index
    %c0_18 = arith.constant 0 : index
    %36 = vector.load %arg6[%c0_17, %c0_18] : memref<24x1xf32, #tpu.memory_space<vmem>>, vector<24x1xf32>
    %37 = vector.broadcast %36 : vector<24x1xf32> to vector<24x24xf32>
    %38 = arith.addf %35, %37 : vector<24x24xf32>
    %cst_19 = arith.constant 0.000000e+00 : f32
    %39 = vector.broadcast %cst_19 : f32 to vector<24x24xf32>
    %40 = arith.cmpf ogt, %38, %39 : vector<24x24xf32>
    %cst_20 = arith.constant 0.000000e+00 : f32
    %41 = vector.broadcast %cst_20 : f32 to vector<24x24xf32>
    %42 = arith.minimumf %38, %41 : vector<24x24xf32>
    %43 = math.exp %42 : vector<24x24xf32>
    %cst_21 = arith.constant 1.000000e+00 : f32
    %44 = vector.broadcast %cst_21 : f32 to vector<24x24xf32>
    %45 = arith.subf %43, %44 : vector<24x24xf32>
    %46 = arith.select %40, %38, %45 : vector<24x24xi1>, vector<24x24xf32>
    %c0_22 = arith.constant 0 : index
    %c0_23 = arith.constant 0 : index
    %47 = vector.load %arg7[%c0_22, %c0_23] : memref<24x2xf32, #tpu.memory_space<vmem>>, vector<24x2xf32>
    %cst_24 = arith.constant dense<0.000000e+00> : vector<24x2xf32>
    %48 = tpu.matmul %46, %47, %cst_24 {dimension_numbers = #tpu.dot_dimension_numbers<[1], [0], [0], [1], [0, 0, 1, 1], [], []>} : vector<24x24xf32>, vector<24x2xf32>, vector<24x2xf32> -> vector<24x2xf32>
    %c0_25 = arith.constant 0 : index
    %c0_26 = arith.constant 0 : index
    %c0_27 = arith.constant 0 : index
    %49 = vector.load %arg8[%c0_25, %c0_26, %c0_27] : memref<1x24x2xf32, #tpu.memory_space<vmem>>, vector<1x24x2xf32>
    %50 = vector.shape_cast %49 : vector<1x24x2xf32> to vector<24x2xf32>
    %51 = vector.shape_cast %48 : vector<24x2xf32> to vector<1x24x2xf32>
    tpu.vector_store %arg8[%c0_25, %c0_26, %c0_27], %51 {strides = array<i32>} : memref<1x24x2xf32, #tpu.memory_space<vmem>>, vector<1x24x2xf32>,
    return
  }
  func.func @transform_0(%arg0: i32) -> (i32, i32, i32) {
    %c0_i32 = arith.constant 0 : i32
    %c0_i32_0 = arith.constant 0 : i32
    %c0_i32_1 = arith.constant 0 : i32
    return %arg0, %c0_i32, %c0_i32_0 : i32, i32, i32
  }
  func.func @transform_1(%arg0: i32) -> (i32, i32) {
    %c0_i32 = arith.constant 0 : i32
    %c0_i32_0 = arith.constant 0 : i32
    %c0_i32_1 = arith.constant 0 : i32
    return %c0_i32, %c0_i32_0 : i32, i32
  }
  func.func @transform_2(%arg0: i32) -> (i32, i32) {
    %c0_i32 = arith.constant 0 : i32
    %c0_i32_0 = arith.constant 0 : i32
    %c0_i32_1 = arith.constant 0 : i32
    return %c0_i32, %c0_i32_0 : i32, i32
  }
  func.func @transform_3(%arg0: i32) -> (i32, i32) {
    %c0_i32 = arith.constant 0 : i32
    %c0_i32_0 = arith.constant 0 : i32
    %c0_i32_1 = arith.constant 0 : i32
    return %c0_i32, %c0_i32_0 : i32, i32
  }
  func.func @transform_4(%arg0: i32) -> (i32, i32) {
    %c0_i32 = arith.constant 0 : i32
    %c0_i32_0 = arith.constant 0 : i32
    %c0_i32_1 = arith.constant 0 : i32
    return %c0_i32, %c0_i32_0 : i32, i32
  }
  func.func @transform_5(%arg0: i32) -> (i32, i32) {
    %c0_i32 = arith.constant 0 : i32
    %c0_i32_0 = arith.constant 0 : i32
    %c0_i32_1 = arith.constant 0 : i32
    return %c0_i32, %c0_i32_0 : i32, i32
  }
  func.func @transform_6(%arg0: i32) -> (i32, i32) {
    %c0_i32 = arith.constant 0 : i32
    %c0_i32_0 = arith.constant 0 : i32
    %c0_i32_1 = arith.constant 0 : i32
    return %c0_i32, %c0_i32_0 : i32, i32
  }
  func.func @transform_7(%arg0: i32) -> (i32, i32, i32) {
    %c0_i32 = arith.constant 0 : i32
    %c0_i32_0 = arith.constant 0 : i32
    %c0_i32_1 = arith.constant 0 : i32
    return %arg0, %c0_i32, %c0_i32_0 : i32, i32, i32
  }
}

</mosaic_0001>

<bundles_post_ra>
// kernel: tpu_custom_call.1
= control target key start
LH: loop header
LB: loop body
LE: loop exit
PB: predicated region body
PF: predicated region fallthrough
CT: control target
= control target key end

     0   :  { %s1136_s24 = smov 0   ;;  %s1375_s0 = inlined_call_operand.vmem [shape: f32[2,8,199], index: 0, kind: input, shape index: {}]   ;;  %s1376_s1 = inlined_call_operand.vmem [shape: f32[24,64], index: 1, kind: input, shape index: {}]   ;;  %s1377_s2 = inlined_call_operand.vmem [shape: f32[24,1], index: 2, kind: input, shape index: {}]   ;;  %s1378_s3 = inlined_call_operand.vmem [shape: f32[192,24], index: 3, kind: input, shape index: {}]   ;;  %s1379_s4 = inlined_call_operand.vmem [shape: f32[24,96], index: 4, kind: input, shape index: {}]   ;;  %s1380_s5 = inlined_call_operand.vmem [shape: f32[24,1], index: 5, kind: input, shape index: {}]   ;;  %s1381_s6 = inlined_call_operand.vmem [shape: f32[24,2], index: 6, kind: input, shape index: {}]   ;;  %s1382_s7 = inlined_call_operand.vmem [shape: f32[2,24,2], index: 7, kind: output, shape index: {}]  }
   0x1 LB: > { %s933_s25 = sadd.s32 4294967295, %s1083_s24   ;;  %p937_p0 = scmp.ge.s32.totalorder %s1083_s24, 1  ;;  %s1083_s24 = sphi %s1136_s24, %s17_s24  }
   0x2   : > { %p237_p1 = scmp.lt.s32.totalorder %s1083_s24, 3 }
   0x4   : > { %p238_p2 = pnand %p937_p0, %p237_p1 }
   0x5   : > { %p269_p3 = scmp.lt.s32.totalorder (!%p238_p2), %s933_s25, 1  ;;  %s1085_s30 = smov (!%p238_p2), 122  }
   0x6   : > { %241 = sbr.rel (%p238_p2) target bundleno = 1252 (0x4e4), region = 48  ;;  %s1086_s8 = smov (!%p238_p2), 121  }
   0x7   : > { %s1087_s9 = smov (!%p238_p2), 123   ;;  %s1088_s10 = smov (!%p238_p2), 124  }
   0x8   : > { %s1090_s11 = smov (!%p238_p2), 125   ;;  %s1091_s12 = smov (!%p238_p2), 126  }
   0x9   : > { %s1092_s13 = smov (!%p238_p2), 127   ;;  %s1094_s20 = smov (!%p238_p2), 1  }
   0xb   : > { %s1384_s25 = smov (!%p269_p3, %s933_s25), 1  ;;  %v1089_v2 = vmov 0.0   ;;  %v504_v3 = vld [vmem:[%s1378_s3 + $0x78] sm:$0xff]  ;;  %v1093_v4 = vmov 0   ;;  %v342_v5 = vld [vmem:[%s1377_s2] sm:$0xff]  ;;  %v343_v6 = vld [vmem:[%s1377_s2 + $0x8] sm:$0xff] }
   0xc   : > { %s967_s26 = sshll.u32 %s1384_s25, 4  ;;  %434 = vmatprep.mubr.f32.mxu0 %v1089_v2  ;;  %522 = vmatprep.subr.mxu1 %v1089_v2  ;;  %v503_v7 = vld [vmem:[%s1378_s3 + $0x70] sm:$0xff]  ;;  %v502_v8 = vld [vmem:[%s1378_s3 + $0x68] sm:$0xff]  ;;  %v501_v10 = vld [vmem:[%s1378_s3 + $0x60] sm:$0xff]  ;;  %vm335_vm0 = vcmask 990208   ;;  %vm327_vm1 = vcmask 998400  }
   0xd   : > { %s273_s29 = scalar_lea.vmem %s1375_s0, %s967_s26  ;;  %1057 = vset.pattern.permute.xlu0 %v1093_v4  ;;  %1058 = vset.pattern.permute.xlu1 %v1093_v4  ;;  %v344_v9 = vld [vmem:[%s1377_s2 + $0x10] sm:$0xff]  ;;  %v500_v11 = vld [vmem:[%s1378_s3 + $0x58] sm:$0xff]  ;;  %v498_v13 = vld [vmem:[%s1378_s3 + $0x48] sm:$0xff]  ;;  %vm319_vm2 = vcmask 1006592   ;;  %vm311_vm3 = vcmask 1014784   ;;  %vm303_vm4 = vcmask 1022976  }
   0xe   : > { %v1150_v0 = vld [vmem:[%s273_s29] sm:$0xff]  ;;  %v1154_v1 = vld [vmem:[%s273_s29 + $0x8] sm:$0xff]  ;;  %523 = vmatpush1.msra.mxu1 %v504_v3  ;;  %v499_v12 = vld [vmem:[%s1378_s3 + $0x50] sm:$0xff]  ;;  %vm295_vm5 = vcmask 1031168   ;;  %vm287_vm6 = vcmask 1039360   ;;  %vm360_vm7 = vcmask 523264  }
   0xf   : > { %323 = vrot.lane.b32.xlu1 %v1150_v0, %s1085_s30  ;;  %331 = vrot.lane.b32.xlu0 %v1150_v0, %s1086_s8  ;;  %v497_v14 = vld [vmem:[%s1378_s3 + $0x40] sm:$0xff]  ;;  %v496_v15 = vld [vmem:[%s1378_s3 + $0x38] sm:$0xff]  ;;  %vm614_vm14 = vcmask 7168   ;;  %vm618_vm15 = vcmask 203776   ;;  %s1037_s18 = smul.u32 24, %s1384_s25 }
  0x10   : > { %524 = vmatprep.subr.mxu1 %v1089_v2  ;;  %v495_v16 = vld [vmem:[%s1378_s3 + $0x30] sm:$0xff]  ;;  %v339_v38 = vld [vmem:[%s1376_s1] sm:$0xff]  ;;  %v340_v39 = vld [vmem:[%s1376_s1 + $0x8] sm:$0xff] }
  0x11   : > { %525 = vmatpush1.msra.mxu1 %v503_v7  ;;  %v341_v40 = vld [vmem:[%s1376_s1 + $0x10] sm:$0xff]  ;;  %v494_v41 = vld [vmem:[%s1378_s3 + $0x28] sm:$0xff]  ;;  %v493_v42 = vld [vmem:[%s1378_s3 + $0x20] sm:$0xff]  ;;  %s278_s21 = scalar_lea.vmem %s1382_s7, %s1037_s18 }
  0x12   : > { %526 = vmatprep.subr.mxu1 %v1089_v2  ;;  %v492_v43 = vld [vmem:[%s1378_s3 + $0x18] sm:$0xff]  ;;  %v491_v44 = vld [vmem:[%s1378_s3 + $0x10] sm:$0xff]  ;;  %v490_v45 = vld [vmem:[%s1378_s3 + $0x8] sm:$0xff] }
  0x13   : > { %325 = vrot.lane.b32.xlu1 %v1154_v1, %s1085_s30  ;;  %333 = vrot.lane.b32.xlu0 %v1154_v1, %s1086_s8  ;;  %v489_v46 = vld [vmem:[%s1378_s3] sm:$0xff]  ;;  %v512_v47 = vld [vmem:[%s1378_s3 + $0xb8] sm:$0xff] }
  0x14   : > { %527 = vmatpush1.msra.mxu1 %v502_v8  ;;  %v511_v48 = vld [vmem:[%s1378_s3 + $0xb0] sm:$0xff]  ;;  %v510_v49 = vld [vmem:[%s1378_s3 + $0xa8] sm:$0xff]  ;;  %v509_v50 = vld [vmem:[%s1378_s3 + $0xa0] sm:$0xff] }
  0x15   : > { %528 = vmatprep.subr.mxu1 %v1089_v2  ;;  %v508_v51 = vld [vmem:[%s1378_s3 + $0x98] sm:$0xff]  ;;  %v507_v52 = vld [vmem:[%s1378_s3 + $0x90] sm:$0xff]  ;;  %v506_v53 = vld [vmem:[%s1378_s3 + $0x88] sm:$0xff] }
  0x16   : > { %529 = vmatpush1.msra.mxu1 %v501_v10  ;;  %v505_v54 = vld [vmem:[%s1378_s3 + $0x80] sm:$0xff] }
  0x17   : > { %317 = vrot.lane.b32.xlu1 %v1154_v1, %s1087_s9  ;;  %315 = vrot.lane.b32.xlu0 %v1150_v0, %s1087_s9 }
  0x18   : > { %530 = vmatprep.subr.mxu1 %v1089_v2 }
  0x19   : > { %531 = vmatpush1.msra.mxu1 %v500_v11 }
  0x1a   : > { %532 = vmatprep.subr.mxu1 %v1089_v2 }
  0x1b   : > { %309 = vrot.lane.b32.xlu1 %v1154_v1, %s1088_s10  ;;  %307 = vrot.lane.b32.xlu0 %v1150_v0, %s1088_s10 }
  0x1c   : > { %533 = vmatpush1.msra.mxu1 %v499_v12 }
  0x1d   : > { %534 = vmatprep.subr.mxu1 %v1089_v2 }
  0x1e   : > { %535 = vmatpush1.msra.mxu1 %v498_v13 }
  0x1f   : > { %301 = vrot.lane.b32.xlu1 %v1154_v1, %s1090_s11  ;;  %299 = vrot.lane.b32.xlu0 %v1150_v0, %s1090_s11 }
  0x20   : > { %536 = vmatprep.subr.mxu1 %v1089_v2 }
  0x21   : > { %537 = vmatpush1.msra.mxu1 %v497_v14 }
  0x22   : > { %538 = vmatprep.subr.mxu1 %v1089_v2 }
  0x23   : > { %293 = vrot.lane.b32.xlu1 %v1154_v1, %s1091_s12  ;;  %291 = vrot.lane.b32.xlu0 %v1150_v0, %s1091_s12 }
  0x24   : > { %539 = vmatpush1.msra.mxu1 %v496_v15 }
  0x25   : > { %540 = vmatprep.subr.mxu1 %v1089_v2 }
  0x26   : > { %541 = vmatpush1.msra.mxu1 %v495_v16 }
  0x27   : > { %285 = vrot.lane.b32.xlu1 %v1154_v1, %s1092_s13  ;;  %283 = vrot.lane.b32.xlu0 %v1150_v0, %s1092_s13 }
  0x28   : > { %542 = vmatprep.subr.mxu1 %v1089_v2 }
  0x29   : > { %543 = vmatpush1.msra.mxu1 %v494_v41 }
  0x2a   : > { %544 = vmatprep.subr.mxu1 %v1089_v2 }
  0x2b   : > { %347 = vperm.xlu0 %1057, %v342_v5   ;;  %352 = vperm.xlu1 %1058, %v343_v6  }
  0x2c   : > { %545 = vmatpush1.msra.mxu1 %v493_v42 }
  0x2d   : > { %546 = vmatprep.subr.mxu1 %v1089_v2 }
  0x2e   : > { %547 = vmatpush1.msra.mxu1 %v492_v43 }
  0x2f   : > { %357 = vperm.xlu1 %1058, %v344_v9   ;;  %548 = vmatprep.subr.mxu1 %v1089_v2 }
  0x30   : > { %549 = vmatpush1.msra.mxu1 %v491_v44 }
  0x31   : > { %550 = vmatprep.subr.mxu1 %v1089_v2 }
  0x32   : > { %551 = vmatpush1.msra.mxu1 %v490_v45 }
  0x33   : > { %552 = vmatprep.subr.mxu1 %v1089_v2 }
  0x34   : > { %553 = vmatpush1.msra.mxu1 %v489_v46 }
  0x35   : > { %570 = vmatprep.subr.mxu1 %v1089_v2 }
  0x36   : > { %571 = vmatpush2.msra.mxu1 %v512_v47 }
  0x37   : > { %572 = vmatprep.subr.mxu1 %v1089_v2 }
  0x38   : > { %573 = vmatpush2.msra.mxu1 %v511_v48 }
  0x39   : > { %574 = vmatprep.subr.mxu1 %v1089_v2 }
  0x3a   : > { %575 = vmatpush2.msra.mxu1 %v510_v49 }
  0x3b   : > { %576 = vmatprep.subr.mxu1 %v1089_v2 }
  0x3c   : > { %577 = vmatpush2.msra.mxu1 %v509_v50 }
  0x3d   : > { %578 = vmatprep.subr.mxu1 %v1089_v2 }
  0x3e   : > { %579 = vmatpush2.msra.mxu1 %v508_v51 }
  0x3f   : > { %580 = vmatprep.subr.mxu1 %v1089_v2 }
  0x40   : > { %581 = vmatpush2.msra.mxu1 %v507_v52  ;;  %v655_v52 = vld [vmem:[%s1380_s5] sm:$0xff] }
  0x41   : > { %582 = vmatprep.subr.mxu1 %v1089_v2 }
  0x42   : > { %583 = vmatpush2.msra.mxu1 %v506_v53  ;;  %v657_v53 = vld [vmem:[%s1380_s5 + $0x10] sm:$0xff] }
  0x43   : > { %584 = vmatprep.subr.mxu1 %v1089_v2 }
  0x44   : > { %585 = vmatpush2.msra.mxu1 %v505_v54  ;;  %v656_v54 = vld [vmem:[%s1380_s5 + $0x8] sm:$0xff] }
  0x81   : > { %v324_v17 = vpop.permute.xlu1 %323  ;;  %v332_v18 = vpop.permute.xlu0 %331 }
  0x85   : > { %v326_v19 = vpop.permute.xlu1 %325  ;;  %v334_v20 = vpop.permute.xlu0 %333 }
  0x86   : > { %386 = vmatprep.subr.mxu0 %v334_v20  ;;  %v336_v21 = vsel %vm335_vm0, %v332_v18, %v334_v20  ;;  %v328_v22 = vsel %vm327_vm1, %v324_v17, %v326_v19  ;;  %vm1095_vm0 = vmmov 0   ;;  %vm673_vm1 = vcmask 785408  }
  0x87   : > { %387 = vmatpush1.msra.mxu0 %v336_v21 }
  0x88   : > { %388 = vmatprep.subr.mxu0 %v326_v19 }
  0x89   : > { %v318_v23 = vpop.permute.xlu1 %317  ;;  %389 = vmatpush1.msra.mxu0 %v328_v22  ;;  %v316_v24 = vpop.permute.xlu0 %315 }
  0x8a   : > { %390 = vmatprep.subr.mxu0 %v318_v23  ;;  %v320_v25 = vsel %vm319_vm2, %v316_v24, %v318_v23  ;;  %vm784_vm2 = vcmask 195584  }
  0x8b   : > { %391 = vmatpush1.msra.mxu0 %v320_v25 }
  0x8d   : > { %v310_v26 = vpop.permute.xlu1 %309  ;;  %v308_v27 = vpop.permute.xlu0 %307 }
  0x8e   : > { %392 = vmatprep.subr.mxu0 %v310_v26  ;;  %v312_v28 = vsel %vm311_vm3, %v308_v27, %v310_v26 }
  0x8f   : > { %393 = vmatpush1.msra.mxu0 %v312_v28 }
  0x91   : > { %v302_v29 = vpop.permute.xlu1 %301  ;;  %v300_v30 = vpop.permute.xlu0 %299 }
  0x92   : > { %394 = vmatprep.subr.mxu0 %v302_v29  ;;  %v304_v31 = vsel %vm303_vm4, %v300_v30, %v302_v29 }
  0x93   : > { %395 = vmatpush1.msra.mxu0 %v304_v31 }
  0x95   : > { %v294_v32 = vpop.permute.xlu1 %293  ;;  %v292_v33 = vpop.permute.xlu0 %291 }
  0x96   : > { %396 = vmatprep.subr.mxu0 %v294_v32  ;;  %v296_v34 = vsel %vm295_vm5, %v292_v33, %v294_v32 }
  0x97   : > { %397 = vmatpush1.msra.mxu0 %v296_v34 }
  0x99   : > { %v286_v35 = vpop.permute.xlu1 %285  ;;  %v284_v36 = vpop.permute.xlu0 %283 }
  0x9a   : > { %398 = vmatprep.subr.mxu0 %v286_v35  ;;  %v288_v37 = vsel %vm287_vm6, %v284_v36, %v286_v35  ;;  %vm874_vm6 = vcmask 15360  }
  0x9b   : > { %399 = vmatpush1.msra.mxu0 %v288_v37 }
  0x9c   : > { %400 = vmatprep.subr.mxu0 %v1154_v1 }
  0x9d   : > { %401 = vmatpush1.msra.mxu0 %v1150_v0 }
  0x9e   : > { %941 = vmatmul.mubr.msk.f32.vlgmr.msra.gmra.mxu0 %vm360_vm7, %v339_v38  ;;  %989 = vmatprep.subr.mxu0 %v1089_v2 }
  0x9f   : > { %440 = vmatprep.mubr.f32.mxu0 %v1089_v2 }
  0xa2   : > { %942 = vmatmul.mubr.msk.f32.gmra.mxu0 %vm360_vm7, %v340_v39 }
  0xa3   : > { %446 = vmatprep.mubr.f32.mxu0 %v1089_v2 }
  0xa6   : > { %943 = vmatmul.mubr.msk.f32.gmra.mxu0 %vm360_vm7, %v341_v40  ;;  %v348_v55 = vpop.permute.xlu0 %347  ;;  %v353_v60 = vpop.permute.xlu1 %352 }
  0xa7   : > { %1013 = vmatprep.mubr.msk.f32.mxu0 %vm1095_vm0, %v1089_v2 }
  0xaa   : > { %v358_v9 = vpop.permute.xlu1 %357 }
 0x15e   : > { %v436_v56 = vpop.f32.mrf.mxu0 }
 0x15f   : > { %v437_v57 = vadd.f32 %v436_v56, %v348_v55 }
 0x160   : > { %v438_v58 = vpop.f32.mrf.mxu0 }
 0x161   : > { %v459_v59 = vmin.f32 %v437_v57, 0.0  ;;  %v439_v61 = vadd.f32 %v438_v58, %v348_v55  ;;  %vm453_vm9 = vcmp.gt.f32.partialorder %v437_v57, 0.0 }
 0x162   : > { %v442_v62 = vpop.f32.mrf.mxu0 }
 0x163   : > { %v465_v63 = vmul.f32 1.442695, %v459_v59  ;;  %v460_v0 = vmin.f32 %v439_v61, 0.0  ;;  %v443_v1 = vadd.f32 %v442_v62, %v353_v60  ;;  %vm454_vm8 = vcmp.gt.f32.partialorder %v439_v61, 0.0 }
 0x164   : > { %v444_v3 = vpop.f32.mrf.mxu0 }
 0x165   : > { %1059 = vpow2.f32 %v465_v63  ;;  %v467_v4 = vmul.f32 1.442695, %v460_v0  ;;  %v461_v5 = vmin.f32 %v443_v1, 0.0  ;;  %v445_v6 = vadd.f32 %v444_v3, %v353_v60  ;;  %v652_v0 = vld [vmem:[%s1379_s4] sm:$0xff]  ;;  %v654_v3 = vld [vmem:[%s1379_s4 + $0x10] sm:$0xff] }
 0x166   : > { %v448_v7 = vpop.f32.mrf.mxu0  ;;  %vm455_vm11 = vcmp.gt.f32.partialorder %v443_v1, 0.0 }
 0x167   : > { %1061 = vpow2.f32 %v467_v4  ;;  %v469_v8 = vmul.f32 1.442695, %v461_v5  ;;  %v462_v10 = vmin.f32 %v445_v6, 0.0  ;;  %v449_v11 = vadd.f32 %v448_v7, %v358_v9  ;;  %v783_v4 = vld [vmem:[%s1381_s6 + $0x10] sm:$0xff]  ;;  %v782_v5 = vld [vmem:[%s1381_s6 + $0x8] sm:$0xff] }
 0x168   : > { %v450_v12 = vpop.f32.mrf.mxu0  ;;  %vm456_vm10 = vcmp.gt.f32.partialorder %v445_v6, 0.0 }
 0x169   : > { %1063 = vpow2.f32 %v469_v8  ;;  %v471_v13 = vmul.f32 1.442695, %v462_v10  ;;  %v451_v14 = vadd.f32 %v450_v12, %v358_v9  ;;  %v463_v15 = vmin.f32 %v449_v11, 0.0 }
 0x16a   : > { %vm457_vm13 = vcmp.gt.f32.partialorder %v449_v11, 0.0 }
 0x16b   : > { %1065 = vpow2.f32 %v471_v13  ;;  %v464_v16 = vmin.f32 %v451_v14, 0.0  ;;  %v473_v17 = vmul.f32 1.442695, %v463_v15  ;;  %vm458_vm12 = vcmp.gt.f32.partialorder %v451_v14, 0.0 }
 0x16d   : > { %v475_v18 = vmul.f32 1.442695, %v464_v16  ;;  %1067 = vpow2.f32 %v473_v17 }
 0x16f   : > { %1069 = vpow2.f32 %v475_v18 }
 0x172   : > { %v1060_v19 = vpop.eup %1059 }
 0x173   : > { %v944_v21 = vadd.f32 -1.0, %v1060_v19 }
 0x174   : > { %v1062_v20 = vpop.eup %1061 }
 0x175   : > { %v945_v22 = vadd.f32 -1.0, %v1062_v20  ;;  %v483_v26 = vsel %vm453_vm9, %v437_v57, %v944_v21 }
 0x176   : > { %v1064_v23 = vpop.eup %1063 }
 0x177   : > { %v484_v24 = vsel %vm454_vm8, %v439_v61, %v945_v22  ;;  %v946_v27 = vadd.f32 -1.0, %v1064_v23 }
 0x178   : > { %v1066_v25 = vpop.eup %1065  ;;  %950 = vmatprep.mubr.msk.f32.mxu1 %vm360_vm7, %v484_v24 }
 0x179   : > { %587 = vmatmul.mubr.f32.vlgmr.msra.gmra.mxu1 %v483_v26  ;;  %v947_v28 = vadd.f32 -1.0, %v1066_v25  ;;  %v485_v32 = vsel %vm455_vm11, %v443_v1, %v946_v27  ;;  %v653_v1 = vld [vmem:[%s1379_s4 + $0x8] sm:$0xff] }
 0x17a   : > { %v1068_v29 = vpop.eup %1067 }
 0x17b   : > { %v486_v30 = vsel %vm456_vm10, %v445_v6, %v947_v28  ;;  %v948_v33 = vadd.f32 -1.0, %v1068_v29  ;;  %v781_v6 = vld [vmem:[%s1381_s6] sm:$0xff] }
 0x17c   : > { %v1070_v31 = vpop.eup %1069  ;;  %951 = vmatprep.mubr.msk.f32.mxu1 %vm360_vm7, %v486_v30 }
 0x17d   : > { %592 = vmatmul.mubr.f32.gmra.mxu1 %v485_v32  ;;  %v949_v34 = vadd.f32 -1.0, %v1070_v31  ;;  %v487_v36 = vsel %vm457_vm13, %v449_v11, %v948_v33 }
 0x17f   : > { %v488_v35 = vsel %vm458_vm12, %v451_v14, %v949_v34 }
 0x180   : > { %952 = vmatprep.mubr.msk.f32.mxu1 %vm360_vm7, %v488_v35 }
 0x181   : > { %597 = vmatmul.mubr.f32.gmra.mxu1 %v487_v36 }
 0x239   : > { %v588_v37 = vpop.f32.mrf.mxu1 }
 0x23b   : > { %v590_v38 = vpop.f32.mrf.mxu1 }
 0x23d   : > { %v593_v39 = vpop.f32.mrf.mxu1 }
 0x23e   : > { %607 = vrot.lane.b32.xlu1 %v593_v39, %s1094_s20 }
 0x23f   : > { %v595_v40 = vpop.f32.mrf.mxu1 }
 0x241   : > { %v598_v41 = vpop.f32.mrf.mxu1 }
 0x242   : > { %609 = vrot.lane.b32.xlu0 %v598_v41, %s1094_s20 }
 0x243   : > { %v600_v42 = vpop.f32.mrf.mxu1 }
 0x246   : > { %605 = vrot.lane.b32.xlu0 %v588_v37, %s1094_s20 }
 0x2b0   : > { %v608_v43 = vpop.permute.xlu1 %607 }
 0x2b1   : > { %v616_v44 = vsel %vm614_vm14, 0.0, %v608_v43 }
 0x2b2   : > { %v620_v45 = vsel %vm618_vm15, %v616_v44, 0.0 }
 0x2b3   : > { %645 = vrot.lane.b32.xlu0 %v620_v45, %s1090_s11 }
 0x2b4   : > { %v610_v46 = vpop.permute.xlu0 %609 }
 0x2b5   : > { %v617_v47 = vsel %vm614_vm14, 0.0, %v610_v46 }
 0x2b6   : > { %v621_v48 = vsel %vm618_vm15, %v617_v47, 0.0 }
 0x2b7   : > { %638 = vrot.lane.b32.xlu0 %v621_v48, %s1091_s12  ;;  %647 = vrot.lane.b32.xlu1 %v621_v48, %s1090_s11 }
 0x2b8   : > { %v606_v49 = vpop.permute.xlu0 %605 }
 0x2b9   : > { %v615_v50 = vsel %vm614_vm14, 0.0, %v606_v49 }
 0x2ba   : > { %v619_v51 = vsel %vm618_vm15, %v615_v50, 0.0 }
 0x2bb   : > { %634 = vrot.lane.b32.xlu0 %v619_v51, %s1091_s12  ;;  %643 = vrot.lane.b32.xlu1 %v619_v51, %s1090_s11 }
 0x2bf   : > { %627 = vrot.lane.b32.xlu0 %v620_v45, %s1092_s13  ;;  %636 = vrot.lane.b32.xlu1 %v620_v45, %s1091_s12 }
 0x2c3   : > { %660 = vperm.xlu0 %1057, %v655_v52   ;;  %629 = vrot.lane.b32.xlu1 %v621_v48, %s1092_s13 }
 0x2c7   : > { %670 = vperm.xlu0 %1057, %v657_v53   ;;  %625 = vrot.lane.b32.xlu1 %v619_v51, %s1092_s13 }
 0x2cb   : > { %665 = vperm.xlu1 %1058, %v656_v54  }
 0x325   : > { %v646_v55 = vpop.permute.xlu0 %645 }
 0x329   : > { %v648_v56 = vpop.permute.xlu1 %647  ;;  %v639_v57 = vpop.permute.xlu0 %638 }
 0x32a   : > { %990 = vmatpush3.msra.mxu0 %v648_v56 }
 0x32b   : > { %991 = vmatprep.subr.mxu0 %v1089_v2 }
 0x32c   : > { %992 = vmatpush3.msra.mxu0 %v646_v55 }
 0x32d   : > { %v644_v58 = vpop.permute.xlu1 %643  ;;  %993 = vmatprep.subr.mxu0 %v1089_v2  ;;  %v635_v59 = vpop.permute.xlu0 %634 }
 0x32e   : > { %994 = vmatpush3.msra.mxu0 %v644_v58 }
 0x32f   : > { %995 = vmatprep.subr.mxu0 %v1089_v2 }
 0x330   : > { %996 = vmatpush3.msra.mxu0 %v639_v57 }
 0x331   : > { %v637_v60 = vpop.permute.xlu1 %636  ;;  %997 = vmatprep.subr.mxu0 %v1089_v2  ;;  %v628_v62 = vpop.permute.xlu0 %627 }
 0x332   : > { %998 = vmatpush3.msra.mxu0 %v637_v60 }
 0x333   : > { %999 = vmatprep.subr.mxu0 %v1089_v2 }
 0x334   : > { %1000 = vmatpush3.msra.mxu0 %v635_v59 }
 0x335   : > { %v630_v61 = vpop.permute.xlu1 %629  ;;  %1001 = vmatprep.subr.mxu0 %v1089_v2 }
 0x336   : > { %1002 = vmatpush3.msra.mxu0 %v630_v61 }
 0x337   : > { %1003 = vmatprep.subr.mxu0 %v1089_v2 }
 0x338   : > { %1004 = vmatpush3.msra.mxu0 %v628_v62 }
 0x339   : > { %v626_v63 = vpop.permute.xlu1 %625  ;;  %1005 = vmatprep.subr.mxu0 %v1089_v2 }
 0x33a   : > { %1006 = vmatpush3.msra.mxu0 %v626_v63 }
 0x33b   : > { %1007 = vmatprep.subr.mxu0 %v1089_v2 }
 0x33c   : > { %1008 = vmatpush3.msk.msra.mxu0 %vm618_vm15, %v617_v47 }
 0x33d   : > { %1009 = vmatprep.subr.mxu0 %v1089_v2 }
 0x33e   : > { %1010 = vmatpush3.msk.msra.mxu0 %vm618_vm15, %v616_v44  ;;  %v661_v7 = vpop.permute.xlu0 %660 }
 0x33f   : > { %1011 = vmatprep.subr.mxu0 %v1089_v2 }
 0x340   : > { %1012 = vmatpush3.msk.msra.mxu0 %vm618_vm15, %v615_v50 }
 0x341   : > { %1014 = vmatmul.mubr.msk.f32.vlgmr.msra.gmra.mxu0 %vm673_vm1, %v652_v0  ;;  %1022 = vmatprep.subr.mxu0 %v1089_v2 }
 0x342   : > { %1016 = vmatprep.mubr.msk.f32.mxu0 %vm1095_vm0, %v1089_v2  ;;  %1023 = vmatpush3.msra.mxu0 %v783_v4  ;;  %v671_v18 = vpop.permute.xlu0 %670 }
 0x343   : > { %1024 = vmatprep.subr.mxu0 %v1089_v2 }
 0x344   : > { %1025 = vmatpush3.msra.mxu0 %v782_v5 }
 0x345   : > { %1017 = vmatmul.mubr.msk.f32.gmra.mxu0 %vm673_vm1, %v653_v1  ;;  %1026 = vmatprep.subr.mxu0 %v1089_v2 }
 0x346   : > { %1019 = vmatprep.mubr.msk.f32.mxu0 %vm1095_vm0, %v1089_v2  ;;  %1027 = vmatpush3.msra.mxu0 %v781_v6  ;;  %v666_v12 = vpop.permute.xlu1 %665 }
 0x349   : > { %1020 = vmatmul.mubr.msk.f32.gmra.mxu0 %vm673_vm1, %v654_v3 }
 0x34a   : > { %1028 = vmatprep.mubr.msk.f32.mxu0 %vm1095_vm0, %v1089_v2 }
 0x401   : > { %v749_v8 = vpop.f32.mrf.mxu0 }
 0x402   : > { %v750_v9 = vadd.f32 %v749_v8, %v661_v7 }
 0x403   : > { %v1015_v10 = vpop.f32.mrf.mxu0 }
 0x404   : > { %v766_v11 = vmin.f32 %v750_v9, 0.0  ;;  %vm763_vm3 = vcmp.gt.f32.partialorder %v750_v9, 0.0 }
 0x405   : > { %v754_v13 = vpop.f32.mrf.mxu0 }
 0x406   : > { %v769_v14 = vmul.f32 1.442695, %v766_v11  ;;  %v755_v15 = vadd.f32 %v754_v13, %v666_v12 }
 0x407   : > { %v1018_v16 = vpop.f32.mrf.mxu0 }
 0x408   : > { %1071 = vpow2.f32 %v769_v14  ;;  %v767_v17 = vmin.f32 %v755_v15, 0.0  ;;  %vm764_vm4 = vcmp.gt.f32.partialorder %v755_v15, 0.0 }
 0x409   : > { %v759_v19 = vpop.f32.mrf.mxu0 }
 0x40a   : > { %v771_v20 = vmul.f32 1.442695, %v767_v17  ;;  %v760_v21 = vadd.f32 %v759_v19, %v671_v18 }
 0x40b   : > { %v1021_v22 = vpop.f32.mrf.mxu0 }
 0x40c   : > { %1073 = vpow2.f32 %v771_v20  ;;  %v768_v23 = vmin.f32 %v760_v21, 0.0  ;;  %vm765_vm5 = vcmp.gt.f32.partialorder %v760_v21, 0.0 }
 0x40e   : > { %v773_v24 = vmul.f32 1.442695, %v768_v23 }
 0x410   : > { %1075 = vpow2.f32 %v773_v24 }
 0x415   : > { %v1072_v25 = vpop.eup %1071 }
 0x416   : > { %v959_v26 = vadd.f32 -1.0, %v1072_v25 }
 0x418   : > { %v778_v27 = vsel %vm763_vm3, %v750_v9, %v959_v26 }
 0x419   : > { %v1074_v28 = vpop.eup %1073  ;;  %1029 = vmatmul.mubr.msk.f32.vlgmr.msra.gmra.mxu0 %vm784_vm2, %v778_v27 }
 0x41a   : > { %1031 = vmatprep.mubr.msk.f32.mxu0 %vm1095_vm0, %v1089_v2  ;;  %v960_v29 = vadd.f32 -1.0, %v1074_v28 }
 0x41c   : > { %v779_v30 = vsel %vm764_vm4, %v755_v15, %v960_v29 }
 0x41d   : > { %v1076_v31 = vpop.eup %1075  ;;  %1032 = vmatmul.mubr.msk.f32.gmra.mxu0 %vm784_vm2, %v779_v30 }
 0x41e   : > { %1034 = vmatprep.mubr.msk.f32.mxu0 %vm1095_vm0, %v1089_v2  ;;  %v961_v32 = vadd.f32 -1.0, %v1076_v31 }
 0x420   : > { %v780_v33 = vsel %vm765_vm5, %v760_v21, %v961_v32 }
 0x421   : > { %1035 = vmatmul.mubr.msk.f32.gmra.mxu0 %vm784_vm2, %v780_v33 }
 0x4d9   : > { %v860_v34 = vpop.f32.mrf.mxu0 }
 0x4da   : > { %875 = vst.msk [vmem:[%s278_s21] sm:$0xff] %vm874_vm6, %v860_v34 }
 0x4db   : > { %v1030_v35 = vpop.f32.mrf.mxu0 }
 0x4dd   : > { %v865_v36 = vpop.f32.mrf.mxu0 }
 0x4de   : > { %876 = vst.msk [vmem:[%s278_s21 + $0x8] sm:$0xff] %vm874_vm6, %v865_v36 }
 0x4df   : > { %v1033_v37 = vpop.f32.mrf.mxu0 }
 0x4e1   : > { %v870_v38 = vpop.f32.mrf.mxu0 }
 0x4e2   : > { %877 = vst.msk [vmem:[%s278_s21 + $0x10] sm:$0xff] %vm874_vm6, %v870_v38 }
 0x4e3   : > { %v1036_v39 = vpop.f32.mrf.mxu0 }
 0x4e4 PF: > { %s17_s24 = sadd.s32 1, %s1083_s24  }
 0x4e5   : > { %p14_p4 = scmp.ge.s32.totalorder %s17_s24, 4  }
 0x4e7   :  { %16 = sbr.rel (!%p14_p4) target bundleno = 1 (0x1), region = 78 }

</bundles_post_ra>
